<compile_context>
chip_gen: v7x
topology: tpu7x:2x2x1
jax: 0.10.0
libtpu: 0.0.40
codegen_flags: <defaults>
</compile_context>

<pallas_src>
import functools

import jax
import jax.numpy as jnp
from jax import lax
from jax.experimental import pallas as pl
from jax.experimental.pallas import tpu as pltpu


def _sepconv_kernel(x_ref, w_ref, o_ref, *scratch, K, stride, padding,
                    H_out, W_out, C_in, C_out, compute_dtype):
    # x_ref:   (NB, C_in, H, W)           NCHW input block (read as-is)
    # w_ref:   (K*C_in, W, W_out*C_out)   geometry-folded weights
    # o_ref:   (NB, H_out, W_out*C_out)   lane-dense output slab
    # scratch (only if padding > 0): (NB, C_in, Hp, W) H-halo-padded activations
    NB = x_ref.shape[0]
    H = x_ref.shape[2]
    W = x_ref.shape[3]
    n_lanes = W_out * C_out

    if padding > 0:
        xpad_ref = scratch[0]
        Hp = H + 2 * padding
        halo = jnp.zeros((NB, C_in, padding, W), xpad_ref.dtype)
        # Halo-only zeroing: the interior is fully overwritten every step, and we
        # deliberately do NOT gate this on program_id (scratch is per-core under
        # "parallel" sharding on multi-TC parts).
        xpad_ref[:, :, 0:padding, :] = halo
        xpad_ref[:, :, Hp - padding:Hp, :] = halo
        xpad_ref[:, :, padding:padding + H, :] = x_ref[...].astype(xpad_ref.dtype)
        src = xpad_ref
    else:
        src = x_ref

    row_span = (H_out - 1) * stride + 1
    acc = jnp.zeros((NB * H_out, n_lanes), jnp.float32)

    # K*C_in small MXU matmuls accumulated in f32.  The MXU has huge slack at
    # these shapes; this removes all XLU concat/relayout work on activations.
    for kh in range(K):
        for ci in range(C_in):
            if stride == 1:
                tap = src[:, ci:ci + 1, kh:kh + H_out, :]        # (NB,1,H_out,W)
            else:
                cols = src[:, ci:ci + 1, :, :]
                tap = lax.slice(cols, (0, 0, kh, 0),
                                (NB, 1, kh + row_span, W),
                                (1, 1, stride, 1))
            lhs = tap.reshape(NB * H_out, W).astype(compute_dtype)
            rhs = w_ref[kh * C_in + ci]                          # (W, W_out*C_out)
            acc = acc + jnp.dot(lhs, rhs,
                                preferred_element_type=jnp.float32)

    # Single unmasked full-width store (last dim is a multiple of 128 lanes here).
    o_ref[...] = acc.reshape(NB, H_out, n_lanes).astype(o_ref.dtype)


def _round_up(v, m):
    return -(-v // m) * m


def separable_conv2d(x_nchw, w_dw, w_pw, *, stride=1, padding=0):
    """x_nchw: (N, C_in, H, W); w_dw: (C_in, 1, K, K); w_pw: (C_out, C_in, 1, 1)."""
    N, C_in, H, W = x_nchw.shape
    K = w_dw.shape[-1]
    C_out = w_pw.shape[0]

    H_out = (H + 2 * padding - K) // stride + 1
    W_out = (W + 2 * padding - K) // stride + 1
    Hp = H + 2 * padding
    n_lanes = W_out * C_out

    compute_dtype = jnp.bfloat16 if x_nchw.dtype == jnp.bfloat16 else jnp.float32
    itemsize = jnp.dtype(compute_dtype).itemsize
    io_itemsize = x_nchw.dtype.itemsize

    # ---- fold depthwise * pointwise and the kw/W geometry (incl. W padding)
    #      into one matmul weight per (kh, ci): w_mat[kh*C_in+ci] is (W, W_out*C_out)
    #      with w_mat[kh*C_in+ci][win, wout*C_out+co] =
    #        sum_kw Weff[kh,kw,ci,co] * [win == wout*stride + kw - padding]  ----
    wdw = w_dw[:, 0, :, :].astype(jnp.float32)                  # (C_in, K, K)
    wpw = w_pw[:, :, 0, 0].astype(jnp.float32)                  # (C_out, C_in)
    weff = jnp.einsum('chk,oc->hkco', wdw, wpw)                 # (K, K, C_in, C_out)
    win = (jnp.arange(W_out)[:, None] * stride
           + jnp.arange(K)[None, :] - padding)                  # (W_out, K)
    onehot = (win[:, :, None] == jnp.arange(W)[None, None, :]).astype(jnp.float32)
    w_mat = jnp.einsum('hkco,wki->hciwo', weff, onehot)         # (K, C_in, W, W_out, C_out)
    w_mat = w_mat.reshape(K * C_in, W, n_lanes).astype(compute_dtype)

    # ---- per-generation batch-chunk / VMEM sizing ----
    try:
        vmem_cap = int(pltpu.get_tpu_info().vmem_capacity_bytes)
    except Exception:
        vmem_cap = 64 * 2**20
    if vmem_cap <= 64 * 2**20:            # v7x-class: 64 MiB physical VMEM
        budget, vmem_clamp = 16 * 2**20, 36 * 2**20
    else:                                 # v5e / v6e: 128 MiB physical VMEM
        budget, vmem_clamp = 28 * 2**20, 80 * 2**20

    lane, sub = 128, 8
    in_b = C_in * _round_up(H, sub) * _round_up(W, lane) * io_itemsize
    pad_b = (C_in * _round_up(Hp, sub) * _round_up(W, lane) * itemsize) if padding > 0 else 0
    out_b = _round_up(H_out, sub) * _round_up(n_lanes, lane) * io_itemsize
    acc_b = _round_up(H_out, sub) * _round_up(n_lanes, lane) * 4
    tmp_b = 4 * _round_up(H_out, sub) * _round_up(W, lane) * 4       # live tap/dot temps
    per_elem = 2 * in_b + pad_b + 2 * out_b + acc_b + tmp_b          # 2x = double-buffered blocks
    w_bytes = 2 * (K * C_in) * _round_up(W, sub) * _round_up(n_lanes, lane) * itemsize

    NB = max(1, min(N, budget // max(per_elem, 1)))
    if N >= 2:
        NB = min(NB, -(-N // 2))          # grid >= 2: both v7x TensorCores get work
    grid = (pl.cdiv(N, NB),)              # ragged last block handled by Pallas masking

    vmem_limit = int(min(vmem_clamp,
                         max(8 * 2**20, NB * per_elem + w_bytes + (2 << 20))))

    kernel = functools.partial(
        _sepconv_kernel, K=K, stride=stride, padding=padding,
        H_out=H_out, W_out=W_out, C_in=C_in, C_out=C_out,
        compute_dtype=compute_dtype)

    scratch_shapes = ([pltpu.VMEM((NB, C_in, Hp, W), compute_dtype)]
                      if padding > 0 else [])

    out_flat = pl.pallas_call(
        kernel,
        out_shape=jax.ShapeDtypeStruct((N, H_out, n_lanes), x_nchw.dtype),
        grid_spec=pltpu.PrefetchScalarGridSpec(
            num_scalar_prefetch=0,
            grid=grid,
            in_specs=[
                pl.BlockSpec((NB, C_in, H, W), lambda b: (b, 0, 0, 0)),
                pl.BlockSpec((K * C_in, W, n_lanes), lambda b: (0, 0, 0)),
            ],
            out_specs=pl.BlockSpec((NB, H_out, n_lanes), lambda b: (b, 0, 0)),
            scratch_shapes=scratch_shapes,
        ),
        compiler_params=pltpu.CompilerParams(
            dimension_semantics=("parallel",),
            vmem_limit_bytes=vmem_limit,
        ),
    )(x_nchw, w_mat)

    # (N, H_out, W_out*C_out) -> (N, H_out, W_out, C_out) -> NCHW (PyTorch layout).
    out = out_flat.reshape(N, H_out, W_out, C_out)
    return jnp.transpose(out, (0, 3, 1, 2))


def _reference(x_nchw, w_dw, w_pw, stride, padding):
    """Plain-JAX reference (lax.conv) for correctness check."""
    x = jnp.transpose(x_nchw, (0, 2, 3, 1))
    C_in = x.shape[-1]
    wdw_hwio = jnp.transpose(w_dw, (2, 3, 1, 0))   # (K, K, 1, C_in)
    dw = lax.conv_general_dilated(
        x, wdw_hwio, window_strides=(stride, stride),
        padding=[(padding, padding), (padding, padding)],
        dimension_numbers=("NHWC", "HWIO", "NHWC"),
        feature_group_count=C_in)
    wpw_hwio = jnp.transpose(w_pw, (2, 3, 1, 0))   # (1, 1, C_in, C_out)
    pw = lax.conv_general_dilated(
        dw, wpw_hwio, window_strides=(1, 1), padding=[(0, 0), (0, 0)],
        dimension_numbers=("NHWC", "HWIO", "NHWC"))
    return jnp.transpose(pw, (0, 3, 1, 2))


if __name__ == "__main__":
    key = jax.random.PRNGKey(0)
    k1, k2, k3 = jax.random.split(key, 3)

    # Module config: SeparableConv2d(in_channels=4, out_channels=8,
    #                                kernel_size=3, stride=1, padding=1, bias=False)
    N, C_in, H, W = 2, 4, 16, 16
    C_out, K, stride, padding = 8, 3, 1, 1

    x = jax.random.normal(k1, (N, C_in, H, W), jnp.float32)
    w_dw = jax.random.normal(k2, (C_in, 1, K, K), jnp.float32) * 0.1      # depthwise weight
    w_pw = jax.random.normal(k3, (C_out, C_in, 1, 1), jnp.float32) * 0.1  # pointwise weight

    out = separable_conv2d(x, w_dw, w_pw, stride=stride, padding=padding)
    out = jax.block_until_ready(out)

    H_out = (H + 2 * padding - K) // stride + 1
    W_out = (W + 2 * padding - K) // stride + 1
    assert out.shape == (N, C_out, H_out, W_out), out.shape

    ref = _reference(x, w_dw, w_pw, stride, padding)
    assert jnp.allclose(out, ref, atol=1e-3, rtol=1e-3), "mismatch vs reference conv"

    print("KERNEL_OK")
</pallas_src>

<mosaic_0001>
module attributes {stable_mosaic.version = 11 : i64} {
  func.func @_sepconv_kernel(%arg0: i32, %arg1: memref<1x4x16x16xf32, #tpu.memory_space<vmem>>, %arg2: memref<12x16x128xf32, #tpu.memory_space<vmem>>, %arg3: memref<1x16x128xf32, #tpu.memory_space<vmem>>, %arg4: memref<1x4x18x16xf32, #tpu.memory_space<vmem>>) attributes {dimension_semantics = [#tpu.dimension_semantics<parallel>], iteration_bounds = array<i64: 2>, scalar_prefetch = 0 : i64, scratch_operands = 1 : i64, tpu.core_type = #tpu.core_type<tc>, window_params = [{transform_indices = @transform_0, window_bounds = array<i64: 1, 4, 16, 16>}, {pipeline_mode = #tpu.pipeline_mode<synchronous>, transform_indices = @transform_1, window_bounds = array<i64: 12, 16, 128>}, {transform_indices = @transform_2, window_bounds = array<i64: 1, 16, 128>}]} {
    %cst = arith.constant 0.000000e+00 : f32
    %0 = vector.broadcast %cst : f32 to vector<1x4x1x16xf32>
    %c0 = arith.constant 0 : index
    %c0_0 = arith.constant 0 : index
    %c0_1 = arith.constant 0 : index
    %c0_2 = arith.constant 0 : index
    %1 = vector.load %arg4[%c0, %c0_0, %c0_1, %c0_2] : memref<1x4x18x16xf32, #tpu.memory_space<vmem>>, vector<1x4x1x16xf32>
    tpu.vector_store %arg4[%c0, %c0_0, %c0_1, %c0_2], %0 {strides = array<i32>} : memref<1x4x18x16xf32, #tpu.memory_space<vmem>>, vector<1x4x1x16xf32>,
    %c0_3 = arith.constant 0 : index
    %c0_4 = arith.constant 0 : index
    %c17 = arith.constant 17 : index
    %c0_5 = arith.constant 0 : index
    %2 = vector.load %arg4[%c0_3, %c0_4, %c17, %c0_5] : memref<1x4x18x16xf32, #tpu.memory_space<vmem>>, vector<1x4x1x16xf32>
    tpu.vector_store %arg4[%c0_3, %c0_4, %c17, %c0_5], %0 {strides = array<i32>} : memref<1x4x18x16xf32, #tpu.memory_space<vmem>>, vector<1x4x1x16xf32>,
    %c0_6 = arith.constant 0 : index
    %c0_7 = arith.constant 0 : index
    %c0_8 = arith.constant 0 : index
    %c0_9 = arith.constant 0 : index
    %3 = vector.load %arg1[%c0_6, %c0_7, %c0_8, %c0_9] : memref<1x4x16x16xf32, #tpu.memory_space<vmem>>, vector<1x4x16x16xf32>
    %c0_10 = arith.constant 0 : index
    %c0_11 = arith.constant 0 : index
    %c1 = arith.constant 1 : index
    %c0_12 = arith.constant 0 : index
    %4 = vector.load %arg4[%c0_10, %c0_11, %c1, %c0_12] : memref<1x4x18x16xf32, #tpu.memory_space<vmem>>, vector<1x4x16x16xf32>
    tpu.vector_store %arg4[%c0_10, %c0_11, %c1, %c0_12], %3 {strides = array<i32>} : memref<1x4x18x16xf32, #tpu.memory_space<vmem>>, vector<1x4x16x16xf32>,
    %cst_13 = arith.constant 0.000000e+00 : f32
    %5 = vector.broadcast %cst_13 : f32 to vector<16x128xf32>
    %c0_14 = arith.constant 0 : index
    %c0_15 = arith.constant 0 : index
    %c0_16 = arith.constant 0 : index
    %c0_17 = arith.constant 0 : index
    %6 = vector.load %arg4[%c0_14, %c0_15, %c0_16, %c0_17] : memref<1x4x18x16xf32, #tpu.memory_space<vmem>>, vector<1x1x16x16xf32>
    %7 = vector.shape_cast %6 : vector<1x1x16x16xf32> to vector<16x16xf32>
    %c0_18 = arith.constant 0 : index
    %c0_19 = arith.constant 0 : index
    %c0_20 = arith.constant 0 : index
    %8 = vector.load %arg2[%c0_18, %c0_19, %c0_20] : memref<12x16x128xf32, #tpu.memory_space<vmem>>, vector<1x16x128xf32>
    %9 = vector.shape_cast %8 : vector<1x16x128xf32> to vector<16x128xf32>
    %cst_21 = arith.constant dense<0.000000e+00> : vector<16x128xf32>
    %10 = tpu.matmul %7, %9, %cst_21 {dimension_numbers = #tpu.dot_dimension_numbers<[1], [0], [0], [1], [0, 0, 1, 1], [], []>} : vector<16x16xf32>, vector<16x128xf32>, vector<16x128xf32> -> vector<16x128xf32>
    %11 = arith.addf %5, %10 : vector<16x128xf32>
    %c0_22 = arith.constant 0 : index
    %c1_23 = arith.constant 1 : index
    %c0_24 = arith.constant 0 : index
    %c0_25 = arith.constant 0 : index
    %12 = vector.load %arg4[%c0_22, %c1_23, %c0_24, %c0_25] : memref<1x4x18x16xf32, #tpu.memory_space<vmem>>, vector<1x1x16x16xf32>
    %13 = vector.shape_cast %12 : vector<1x1x16x16xf32> to vector<16x16xf32>
    %c1_26 = arith.constant 1 : index
    %c0_27 = arith.constant 0 : index
    %c0_28 = arith.constant 0 : index
    %14 = vector.load %arg2[%c1_26, %c0_27, %c0_28] : memref<12x16x128xf32, #tpu.memory_space<vmem>>, vector<1x16x128xf32>
    %15 = vector.shape_cast %14 : vector<1x16x128xf32> to vector<16x128xf32>
    %cst_29 = arith.constant dense<0.000000e+00> : vector<16x128xf32>
    %16 = tpu.matmul %13, %15, %cst_29 {dimension_numbers = #tpu.dot_dimension_numbers<[1], [0], [0], [1], [0, 0, 1, 1], [], []>} : vector<16x16xf32>, vector<16x128xf32>, vector<16x128xf32> -> vector<16x128xf32>
    %17 = arith.addf %11, %16 : vector<16x128xf32>
    %c0_30 = arith.constant 0 : index
    %c2 = arith.constant 2 : index
    %c0_31 = arith.constant 0 : index
    %c0_32 = arith.constant 0 : index
    %18 = vector.load %arg4[%c0_30, %c2, %c0_31, %c0_32] : memref<1x4x18x16xf32, #tpu.memory_space<vmem>>, vector<1x1x16x16xf32>
    %19 = vector.shape_cast %18 : vector<1x1x16x16xf32> to vector<16x16xf32>
    %c2_33 = arith.constant 2 : index
    %c0_34 = arith.constant 0 : index
    %c0_35 = arith.constant 0 : index
    %20 = vector.load %arg2[%c2_33, %c0_34, %c0_35] : memref<12x16x128xf32, #tpu.memory_space<vmem>>, vector<1x16x128xf32>
    %21 = vector.shape_cast %20 : vector<1x16x128xf32> to vector<16x128xf32>
    %cst_36 = arith.constant dense<0.000000e+00> : vector<16x128xf32>
    %22 = tpu.matmul %19, %21, %cst_36 {dimension_numbers = #tpu.dot_dimension_numbers<[1], [0], [0], [1], [0, 0, 1, 1], [], []>} : vector<16x16xf32>, vector<16x128xf32>, vector<16x128xf32> -> vector<16x128xf32>
    %23 = arith.addf %17, %22 : vector<16x128xf32>
    %c0_37 = arith.constant 0 : index
    %c3 = arith.constant 3 : index
    %c0_38 = arith.constant 0 : index
    %c0_39 = arith.constant 0 : index
    %24 = vector.load %arg4[%c0_37, %c3, %c0_38, %c0_39] : memref<1x4x18x16xf32, #tpu.memory_space<vmem>>, vector<1x1x16x16xf32>
    %25 = vector.shape_cast %24 : vector<1x1x16x16xf32> to vector<16x16xf32>
    %c3_40 = arith.constant 3 : index
    %c0_41 = arith.constant 0 : index
    %c0_42 = arith.constant 0 : index
    %26 = vector.load %arg2[%c3_40, %c0_41, %c0_42] : memref<12x16x128xf32, #tpu.memory_space<vmem>>, vector<1x16x128xf32>
    %27 = vector.shape_cast %26 : vector<1x16x128xf32> to vector<16x128xf32>
    %cst_43 = arith.constant dense<0.000000e+00> : vector<16x128xf32>
    %28 = tpu.matmul %25, %27, %cst_43 {dimension_numbers = #tpu.dot_dimension_numbers<[1], [0], [0], [1], [0, 0, 1, 1], [], []>} : vector<16x16xf32>, vector<16x128xf32>, vector<16x128xf32> -> vector<16x128xf32>
    %29 = arith.addf %23, %28 : vector<16x128xf32>
    %c0_44 = arith.constant 0 : index
    %c0_45 = arith.constant 0 : index
    %c1_46 = arith.constant 1 : index
    %c0_47 = arith.constant 0 : index
    %30 = vector.load %arg4[%c0_44, %c0_45, %c1_46, %c0_47] : memref<1x4x18x16xf32, #tpu.memory_space<vmem>>, vector<1x1x16x16xf32>
    %31 = vector.shape_cast %30 : vector<1x1x16x16xf32> to vector<16x16xf32>
    %c4 = arith.constant 4 : index
    %c0_48 = arith.constant 0 : index
    %c0_49 = arith.constant 0 : index
    %32 = vector.load %arg2[%c4, %c0_48, %c0_49] : memref<12x16x128xf32, #tpu.memory_space<vmem>>, vector<1x16x128xf32>
    %33 = vector.shape_cast %32 : vector<1x16x128xf32> to vector<16x128xf32>
    %cst_50 = arith.constant dense<0.000000e+00> : vector<16x128xf32>
    %34 = tpu.matmul %31, %33, %cst_50 {dimension_numbers = #tpu.dot_dimension_numbers<[1], [0], [0], [1], [0, 0, 1, 1], [], []>} : vector<16x16xf32>, vector<16x128xf32>, vector<16x128xf32> -> vector<16x128xf32>
    %35 = arith.addf %29, %34 : vector<16x128xf32>
    %c0_51 = arith.constant 0 : index
    %c1_52 = arith.constant 1 : index
    %c1_53 = arith.constant 1 : index
    %c0_54 = arith.constant 0 : index
    %36 = vector.load %arg4[%c0_51, %c1_52, %c1_53, %c0_54] : memref<1x4x18x16xf32, #tpu.memory_space<vmem>>, vector<1x1x16x16xf32>
    %37 = vector.shape_cast %36 : vector<1x1x16x16xf32> to vector<16x16xf32>
    %c5 = arith.constant 5 : index
    %c0_55 = arith.constant 0 : index
    %c0_56 = arith.constant 0 : index
    %38 = vector.load %arg2[%c5, %c0_55, %c0_56] : memref<12x16x128xf32, #tpu.memory_space<vmem>>, vector<1x16x128xf32>
    %39 = vector.shape_cast %38 : vector<1x16x128xf32> to vector<16x128xf32>
    %cst_57 = arith.constant dense<0.000000e+00> : vector<16x128xf32>
    %40 = tpu.matmul %37, %39, %cst_57 {dimension_numbers = #tpu.dot_dimension_numbers<[1], [0], [0], [1], [0, 0, 1, 1], [], []>} : vector<16x16xf32>, vector<16x128xf32>, vector<16x128xf32> -> vector<16x128xf32>
    %41 = arith.addf %35, %40 : vector<16x128xf32>
    %c0_58 = arith.constant 0 : index
    %c2_59 = arith.constant 2 : index
    %c1_60 = arith.constant 1 : index
    %c0_61 = arith.constant 0 : index
    %42 = vector.load %arg4[%c0_58, %c2_59, %c1_60, %c0_61] : memref<1x4x18x16xf32, #tpu.memory_space<vmem>>, vector<1x1x16x16xf32>
    %43 = vector.shape_cast %42 : vector<1x1x16x16xf32> to vector<16x16xf32>
    %c6 = arith.constant 6 : index
    %c0_62 = arith.constant 0 : index
    %c0_63 = arith.constant 0 : index
    %44 = vector.load %arg2[%c6, %c0_62, %c0_63] : memref<12x16x128xf32, #tpu.memory_space<vmem>>, vector<1x16x128xf32>
    %45 = vector.shape_cast %44 : vector<1x16x128xf32> to vector<16x128xf32>
    %cst_64 = arith.constant dense<0.000000e+00> : vector<16x128xf32>
    %46 = tpu.matmul %43, %45, %cst_64 {dimension_numbers = #tpu.dot_dimension_numbers<[1], [0], [0], [1], [0, 0, 1, 1], [], []>} : vector<16x16xf32>, vector<16x128xf32>, vector<16x128xf32> -> vector<16x128xf32>
    %47 = arith.addf %41, %46 : vector<16x128xf32>
    %c0_65 = arith.constant 0 : index
    %c3_66 = arith.constant 3 : index
    %c1_67 = arith.constant 1 : index
    %c0_68 = arith.constant 0 : index
    %48 = vector.load %arg4[%c0_65, %c3_66, %c1_67, %c0_68] : memref<1x4x18x16xf32, #tpu.memory_space<vmem>>, vector<1x1x16x16xf32>
    %49 = vector.shape_cast %48 : vector<1x1x16x16xf32> to vector<16x16xf32>
    %c7 = arith.constant 7 : index
    %c0_69 = arith.constant 0 : index
    %c0_70 = arith.constant 0 : index
    %50 = vector.load %arg2[%c7, %c0_69, %c0_70] : memref<12x16x128xf32, #tpu.memory_space<vmem>>, vector<1x16x128xf32>
    %51 = vector.shape_cast %50 : vector<1x16x128xf32> to vector<16x128xf32>
    %cst_71 = arith.constant dense<0.000000e+00> : vector<16x128xf32>
    %52 = tpu.matmul %49, %51, %cst_71 {dimension_numbers = #tpu.dot_dimension_numbers<[1], [0], [0], [1], [0, 0, 1, 1], [], []>} : vector<16x16xf32>, vector<16x128xf32>, vector<16x128xf32> -> vector<16x128xf32>
    %53 = arith.addf %47, %52 : vector<16x128xf32>
    %c0_72 = arith.constant 0 : index
    %c0_73 = arith.constant 0 : index
    %c2_74 = arith.constant 2 : index
    %c0_75 = arith.constant 0 : index
    %54 = vector.load %arg4[%c0_72, %c0_73, %c2_74, %c0_75] : memref<1x4x18x16xf32, #tpu.memory_space<vmem>>, vector<1x1x16x16xf32>
    %55 = vector.shape_cast %54 : vector<1x1x16x16xf32> to vector<16x16xf32>
    %c8 = arith.constant 8 : index
    %c0_76 = arith.constant 0 : index
    %c0_77 = arith.constant 0 : index
    %56 = vector.load %arg2[%c8, %c0_76, %c0_77] : memref<12x16x128xf32, #tpu.memory_space<vmem>>, vector<1x16x128xf32>
    %57 = vector.shape_cast %56 : vector<1x16x128xf32> to vector<16x128xf32>
    %cst_78 = arith.constant dense<0.000000e+00> : vector<16x128xf32>
    %58 = tpu.matmul %55, %57, %cst_78 {dimension_numbers = #tpu.dot_dimension_numbers<[1], [0], [0], [1], [0, 0, 1, 1], [], []>} : vector<16x16xf32>, vector<16x128xf32>, vector<16x128xf32> -> vector<16x128xf32>
    %59 = arith.addf %53, %58 : vector<16x128xf32>
    %c0_79 = arith.constant 0 : index
    %c1_80 = arith.constant 1 : index
    %c2_81 = arith.constant 2 : index
    %c0_82 = arith.constant 0 : index
    %60 = vector.load %arg4[%c0_79, %c1_80, %c2_81, %c0_82] : memref<1x4x18x16xf32, #tpu.memory_space<vmem>>, vector<1x1x16x16xf32>
    %61 = vector.shape_cast %60 : vector<1x1x16x16xf32> to vector<16x16xf32>
    %c9 = arith.constant 9 : index
    %c0_83 = arith.constant 0 : index
    %c0_84 = arith.constant 0 : index
    %62 = vector.load %arg2[%c9, %c0_83, %c0_84] : memref<12x16x128xf32, #tpu.memory_space<vmem>>, vector<1x16x128xf32>
    %63 = vector.shape_cast %62 : vector<1x16x128xf32> to vector<16x128xf32>
    %cst_85 = arith.constant dense<0.000000e+00> : vector<16x128xf32>
    %64 = tpu.matmul %61, %63, %cst_85 {dimension_numbers = #tpu.dot_dimension_numbers<[1], [0], [0], [1], [0, 0, 1, 1], [], []>} : vector<16x16xf32>, vector<16x128xf32>, vector<16x128xf32> -> vector<16x128xf32>
    %65 = arith.addf %59, %64 : vector<16x128xf32>
    %c0_86 = arith.constant 0 : index
    %c2_87 = arith.constant 2 : index
    %c2_88 = arith.constant 2 : index
    %c0_89 = arith.constant 0 : index
    %66 = vector.load %arg4[%c0_86, %c2_87, %c2_88, %c0_89] : memref<1x4x18x16xf32, #tpu.memory_space<vmem>>, vector<1x1x16x16xf32>
    %67 = vector.shape_cast %66 : vector<1x1x16x16xf32> to vector<16x16xf32>
    %c10 = arith.constant 10 : index
    %c0_90 = arith.constant 0 : index
    %c0_91 = arith.constant 0 : index
    %68 = vector.load %arg2[%c10, %c0_90, %c0_91] : memref<12x16x128xf32, #tpu.memory_space<vmem>>, vector<1x16x128xf32>
    %69 = vector.shape_cast %68 : vector<1x16x128xf32> to vector<16x128xf32>
    %cst_92 = arith.constant dense<0.000000e+00> : vector<16x128xf32>
    %70 = tpu.matmul %67, %69, %cst_92 {dimension_numbers = #tpu.dot_dimension_numbers<[1], [0], [0], [1], [0, 0, 1, 1], [], []>} : vector<16x16xf32>, vector<16x128xf32>, vector<16x128xf32> -> vector<16x128xf32>
    %71 = arith.addf %65, %70 : vector<16x128xf32>
    %c0_93 = arith.constant 0 : index
    %c3_94 = arith.constant 3 : index
    %c2_95 = arith.constant 2 : index
    %c0_96 = arith.constant 0 : index
    %72 = vector.load %arg4[%c0_93, %c3_94, %c2_95, %c0_96] : memref<1x4x18x16xf32, #tpu.memory_space<vmem>>, vector<1x1x16x16xf32>
    %73 = vector.shape_cast %72 : vector<1x1x16x16xf32> to vector<16x16xf32>
    %c11 = arith.constant 11 : index
    %c0_97 = arith.constant 0 : index
    %c0_98 = arith.constant 0 : index
    %74 = vector.load %arg2[%c11, %c0_97, %c0_98] : memref<12x16x128xf32, #tpu.memory_space<vmem>>, vector<1x16x128xf32>
    %75 = vector.shape_cast %74 : vector<1x16x128xf32> to vector<16x128xf32>
    %cst_99 = arith.constant dense<0.000000e+00> : vector<16x128xf32>
    %76 = tpu.matmul %73, %75, %cst_99 {dimension_numbers = #tpu.dot_dimension_numbers<[1], [0], [0], [1], [0, 0, 1, 1], [], []>} : vector<16x16xf32>, vector<16x128xf32>, vector<16x128xf32> -> vector<16x128xf32>
    %77 = arith.addf %71, %76 : vector<16x128xf32>
    %78 = vector.shape_cast %77 : vector<16x128xf32> to vector<1x16x128xf32>
    %c0_100 = arith.constant 0 : index
    %c0_101 = arith.constant 0 : index
    %c0_102 = arith.constant 0 : index
    %79 = vector.load %arg3[%c0_100, %c0_101, %c0_102] : memref<1x16x128xf32, #tpu.memory_space<vmem>>, vector<1x16x128xf32>
    tpu.vector_store %arg3[%c0_100, %c0_101, %c0_102], %78 {strides = array<i32>} : memref<1x16x128xf32, #tpu.memory_space<vmem>>, vector<1x16x128xf32>,
    return
  }
  func.func @transform_0(%arg0: i32) -> (i32, i32, i32, i32) {
    %c0_i32 = arith.constant 0 : i32
    %c0_i32_0 = arith.constant 0 : i32
    %c0_i32_1 = arith.constant 0 : i32
    %c0_i32_2 = arith.constant 0 : i32
    return %arg0, %c0_i32, %c0_i32_0, %c0_i32_1 : i32, i32, i32, i32
  }
  func.func @transform_1(%arg0: i32) -> (i32, i32, i32) {
    %c0_i32 = arith.constant 0 : i32
    %c0_i32_0 = arith.constant 0 : i32
    %c0_i32_1 = arith.constant 0 : i32
    %c0_i32_2 = arith.constant 0 : i32
    return %c0_i32, %c0_i32_0, %c0_i32_1 : i32, i32, i32
  }
  func.func @transform_2(%arg0: i32) -> (i32, i32, i32) {
    %c0_i32 = arith.constant 0 : i32
    %c0_i32_0 = arith.constant 0 : i32
    %c0_i32_1 = arith.constant 0 : i32
    return %arg0, %c0_i32, %c0_i32_0 : i32, i32, i32
  }
}

</mosaic_0001>

<bundles_post_ra>
// kernel: tpu_custom_call.1
= control target key start
LH: loop header
LB: loop body
LE: loop exit
PB: predicated region body
PF: predicated region fallthrough
CT: control target
= control target key end

     0   :  { %7 = vsyncpa [#allocation4], 0  ;;  %s2065_s0 = inlined_call_operand.hbm [shape: f32[2,4,16,16], index: 0, kind: input, shape index: {}]   ;;  %s2066_s1 = inlined_call_operand.hbm [shape: f32[12,16,128], index: 1, kind: input, shape index: {}]   ;;  %s2067_s2 = inlined_call_operand.hbm [shape: f32[2,16,128], index: 2, kind: output, shape index: {}]  }
   0x1   :  { %9 = vsyncpa [#allocation4 + $0x1], 0 }
   0x2   :  { %10 = vsyncpa [#allocation7], 0 }
   0x3   :  { %11 = vsyncpa [#allocation5], 0 }
   0x4   :  { %13 = vsyncpa [#allocation5 + $0x1], 0  ;;  %s1815_s9 = smov 0   ;;  %s1817_s10 = smov 0  }
   0x5   :  { %s1819_s11 = smov 0   ;;  %s1821_s12 = smov 0  }
   0x6 LB: > { %s1836_s13 = sadd.s32 4294967295, %s1790_s12   ;;  %s1356_s14 = sadd.s32 4294967294, %s1790_s12   ;;  %s1790_s12 = sphi %s1821_s12, %s2087_s12   ;;  %s1786_s11 = sphi %s1819_s11, %s2086_s11   ;;  %s1782_s10 = sphi %s1817_s10, %s2085_s10   ;;  %s1778_s9 = sphi %s1815_s9, %s2084_s9  }
   0x7   : > { %p39_p0 = scmp.ne.s32.totalorder %s1782_s10, %s1778_s9  ;;  %p2068_p1 = scmp.eq.s32.totalorder %s1836_s13, 0 }
   0x8   : > { %p90_p3 = scmp.eq.s32.totalorder %s1356_s14, 1  ;;  %p1357_p5 = scmp.ge.s32.totalorder %s1790_s12, 1 }
   0x9   : > { %p1845_p4 = por %p2068_p1, %p39_p0  ;;  %p97_p7 = scmp.lt.s32.totalorder %s1790_s12, 3 }
   0xa   : > { %p1850_p6 = por %p90_p3, %p39_p0  ;;  %s1792_s18 = smov [#allocation6]  }
   0xb   : > { %s2071_s15 = scalar_select %p1845_p4, 1, 0 }
   0xc   : > { %s2072_s16 = scalar_select %p1850_p6, 1, 0 }
   0xd   : > { %p1855_p8 = pnand %p1357_p5, %p97_p7  ;;  %s109_s19 = sshll.u32 %s1792_s18, 4  ;;  %s1859_s19 = int_to_ptr.vmem [resolvable:$true] %s109_s19 }
   0xe   : > { %s1871_s21 = sadd.s32 1, %s1790_s12   ;;  %s26_s22 = sadd.s32 1, %s1786_s11 }
   0xf   : > { %s2073_s17 = scalar_select %p1855_p8, 1, 0 }
  0x10   : > { %p1608_p9 = pneg %p1855_p8  ;;  %s23_s23 = ssub.s32 %s1790_s12, %s1871_s21 }
  0x11   : > { %s1662_s26 = scalar_lea.hbm %s2066_s1, 3072 }
  0x12   : > { %p1866_p11 = pnand %p1608_p9, %p2068_p1  ;;  %p1663_p12 = scmp.ne.s32.totalorder %s2066_s1, %s1662_s26 }
  0x13   : > { %p1669_p5 = scmp.lt.u32.totalorder %s1662_s26, %s2066_s1 }
  0x14   : > { %p1664_p13 = pneg %p1866_p11 }
  0x16   : > { %p1665_p0 = pnand %p1664_p13, %p1663_p12 }
  0x18   : > { %p1666_p3 = pneg %p1665_p0 }
  0x1a   : > { %p1671_p7 = pnand %p1669_p5, %p1666_p3 }
  0x1c   : > { %1674 = shalt.err (!%p1671_p7)
}
  0x1d   : > { %s1675_s3 = scalar_lea.vmem %s1859_s19, 3072  ;;  %p1683_p2 = scmp.lt.s32.totalorder %s1859_s19, %s1859_s19 }
  0x1e   : > { %p1676_p9 = scmp.ne.s32.totalorder %s1859_s19, %s1675_s3  ;;  %p1684_p6 = scmp.lt.s32.totalorder %s1675_s3, %s1675_s3 }
  0x20   : > { %p1678_p10 = pnand %p1676_p9, %p1664_p13  ;;  %p1685_p4 = por %p1684_p6, %p1683_p2 }
  0x22   : > { %p1679_p1 = pneg %p1678_p10 }
  0x24   : > { %p1686_p8 = pnand %p1685_p4, %p1679_p1 }
  0x26   : > { %1689 = shalt.err (!%p1686_p8)
}
  0x27   : > { %s1793_s4 = smov 128   ;;  %s1794_s5 = smov 8  }
  0x28   : > { %1611 = dma.hbm_to_vmem [thread:$0]  (!%p1866_p11), %s2066_s1, 3072, %s1859_s19, [#allocation7], %s1793_s4, %s1793_s4, %s1794_s5  }
  0x29   : > { %p24_p1 = scmp.eq.s32.totalorder %s23_s23, 0  ;;  %p33_p2 = scmp.ne.s32.totalorder %s1786_s11, %s1782_s10 }
  0x2a   : > { %p34_p4 = scmp.eq.s32.totalorder %s1790_s12, 0  ;;  %p1621_p6 = scmp.lt.s32.totalorder %s1790_s12, 2 }
  0x2b   : > { %s1905_s8 = scalar_select %p24_p1, %s1786_s11, %s26_s22  }
  0x2c   : > { %p35_p8 = por %p34_p4, %p33_p2  ;;  %p2075_p10 = scmp.eq.s32.totalorder %s1836_s13, 1 }
  0x2d   : > { %s123_s18 = sand.u32 1, %s1786_s11   ;;  %s1396_s20 = sshll.u32 %s1790_s12, 10 }
  0x2e   : > { %p1909_p12 = por %p2075_p10, %p33_p2  ;;  %s1360_s24 = sshll.u32 %s123_s18, 6 }
  0x2f   : > { %s1918_s27 = scalar_lea.hbm %s2065_s0, %s1396_s20  ;;  %s127_s19 = scalar_lea.vmem [#allocation3], %s1360_s24 }
  0x30   : > { %s134_s22 = sshll.u32 %s127_s19, 4  ;;  %p1920_p11 = pnand %p1621_p6, %p35_p8  ;;  %s1924_s22 = int_to_ptr.vmem [resolvable:$true] %s134_s22 }
  0x31   : > { %s1926_s28 = scalar_lea.sflag [#allocation4], %s123_s18  ;;  %s1690_s29 = scalar_lea.hbm %s1918_s27, 1024 }
  0x32   : > { %p1691_p13 = scmp.ne.s32.totalorder %s1918_s27, %s1690_s29  ;;  %p1692_p0 = pneg %p1920_p11 }
  0x33   : > { %s1695_s6 = scalar_lea.hbm %s2065_s0, 2048  ;;  %p1696_p7 = scmp.lt.u32.totalorder %s1918_s27, %s2065_s0 }
  0x34   : > { %p1693_p3 = pnand %p1692_p0, %p1691_p13  ;;  %p1697_p9 = scmp.lt.u32.totalorder %s1695_s6, %s1690_s29 }
  0x35   : > { %p1699_p2 = scmp.lt.u32.totalorder %s1690_s29, %s1918_s27 }
  0x36   : > { %p1694_p5 = pneg %p1693_p3  ;;  %p1698_p1 = por %p1697_p9, %p1696_p7 }
  0x38   : > { %p1700_p4 = por %p1699_p2, %p1698_p1 }
  0x3a   : > { %p1701_p6 = pnand %p1700_p4, %p1694_p5 }
  0x3c   : > { %1704 = shalt.err (!%p1701_p6)
}
  0x3d   : > { %s1705_s18 = scalar_lea.vmem %s1924_s22, 1024  ;;  %s1795_s24 = smov [#allocation3]  }
  0x3e   : > { %p1706_p8 = scmp.ne.s32.totalorder %s1924_s22, %s1705_s18  ;;  %s1710_s25 = sshll.u32 %s1795_s24, 4  ;;  %s1711_s25 = int_to_ptr.vmem [resolvable:$false] %s1710_s25 }
  0x3f   : > { %s1712_s26 = scalar_lea.vmem %s1711_s25, 2048  ;;  %p1713_p3 = scmp.lt.s32.totalorder %s1924_s22, %s1711_s25 }
  0x40   : > { %p1708_p10 = pnand %p1706_p8, %p1692_p0  ;;  %p1714_p7 = scmp.lt.s32.totalorder %s1712_s26, %s1705_s18 }
  0x42   : > { %p1709_p13 = pneg %p1708_p10  ;;  %p1715_p9 = por %p1714_p7, %p1713_p3 }
  0x44   : > { %p1716_p1 = pnand %p1715_p9, %p1709_p13 }
  0x46   : > { %1719 = shalt.err (!%p1716_p1)
}
  0x47   : > { %1615 = dma.hbm_to_vmem [thread:$0]  (!%p1920_p11), %s1918_s27, 1024, %s1924_s22, %s1926_s28, %s1793_s4, %s1793_s4, %s1794_s5  }
  0x48   : > { %p2078_p0 = scmp.ne.s32.totalorder %s2073_s17, 0 }
  0x49   : > { %s1960_s19 = sand.u32 (!%p2078_p0), 1, %s1782_s10   ;;  %p2079_p5 = scmp.ne.s32.totalorder (!%p2078_p0), %s2071_s15, 0 }
  0x4a   : > { %146 = sbr.rel (%p2078_p0) target bundleno = 371 (0x173), region = 28  ;;  %s1364_s29 = sshll.u32 (!%p2078_p0), %s1960_s19, 6 }
  0x4b   : > { %s149_s30 = scalar_lea.sflag (!%p2078_p0), [#allocation4], %s1960_s19  ;;  %s1964_s3 = scalar_lea.vmem (!%p2078_p0), [#allocation3], %s1364_s29 }
  0x51   : > { %1765 = dma.done.wait (%p2079_p5), %s149_s30, 1024  }
  0x52   : > { %1767 = vsyncadd (%p2079_p5), %s149_s30, 4294966272  ;;  %p2080_p11 = scmp.eq.s32.totalorder %s1836_s13, 0 }
  0x54   : > { %1769 = dma.done.wait (%p2080_p11), [#allocation7], 3072   ;;  %p2081_p2 = pmov %p2080_p11 }
  0x55   : > { %vm177_vm0 = vcmask 122880   ;;  %v1796_v0 = vmov 0.0   ;;  %vm194_vm1 = vcmask 130048   ;;  %v211_v1 = vld [vmem:[#allocation6 + $0x10] sm:$0xff]  ;;  %v212_v2 = vld [vmem:[#allocation6 + $0x18] sm:$0xff]  ;;  %v732_v3 = vld [vmem:[#allocation6 + $0x60] sm:$0xff] }
  0x56   : > { %1771 = vsyncadd (%p2081_p2), [#allocation7], 4294964224  ;;  %179 = vst.msk [vmem:[#allocation2 + $0x18] sm:$0x1] %vm177_vm0, %v1796_v0  ;;  %v1530_v4 = vpack.c.bf16 %v212_v2, %v211_v1  ;;  %v733_v5 = vld [vmem:[#allocation6 + $0x68] sm:$0xff]  ;;  %v188_v6 = vld [vmem:[%s1964_s3 + $0x10] sm:$0xff] }
  0x57   : > { %178 = vst.msk [vmem:[#allocation2] sm:$0x1] %vm177_vm0, %v1796_v0  ;;  %180 = vst.msk [vmem:[#allocation2 + $0x30] sm:$0x1] %vm177_vm0, %v1796_v0  ;;  %v205_v7 = vld [vmem:[#allocation6] sm:$0xff]  ;;  %v1554_v8 = vpack.c.bf16 %v733_v5, %v732_v3  ;;  %v206_v9 = vld [vmem:[#allocation6 + $0x8] sm:$0xff] }
  0x58   : > { %181 = vst.msk [vmem:[#allocation2 + $0x48] sm:$0x1] %vm177_vm0, %v1796_v0  ;;  %182 = vst.msk [vmem:[#allocation2 + $0x11] sm:$0x1] %vm177_vm0, %v1796_v0  ;;  %v190_v10 = vld [vmem:[%s1964_s3 + $0x20] sm:$0xff]  ;;  %v820_v11 = vld [vmem:[#allocation6 + $0x70] sm:$0xff]  ;;  %1531 = vmatprep.subr.bf16.mxu1 %v1530_v4  ;;  %v1534_v12 = vpack.c.bf16 %v206_v9, %v205_v7 }
  0x59   : > { %183 = vst.msk [vmem:[#allocation2 + $0x29] sm:$0x1] %vm177_vm0, %v1796_v0  ;;  %184 = vst.msk [vmem:[#allocation2 + $0x41] sm:$0x1] %vm177_vm0, %v1796_v0  ;;  %v821_v13 = vld [vmem:[#allocation6 + $0x78] sm:$0xff]  ;;  %v191_v15 = vld [vmem:[%s1964_s3 + $0x28] sm:$0xff]  ;;  %1555 = vmatprep.subr.bf16.mxu0 %v1554_v8  ;;  %1533 = vmatpush3.bf16.msra.mxu1 %v1530_v4 }
  0x5a   : > { %185 = vst.msk [vmem:[#allocation2 + $0x59] sm:$0x1] %vm177_vm0, %v1796_v0  ;;  %v189_v14 = vld [vmem:[%s1964_s3 + $0x18] sm:$0xff]  ;;  %v1558_v16 = vpack.c.bf16 %v821_v13, %v820_v11  ;;  %v186_v17 = vld [vmem:[%s1964_s3] sm:$0xff]  ;;  %1557 = vmatpush3.bf16.msra.mxu0 %v1554_v8  ;;  %1535 = vmatprep.subr.bf16.mxu1 %v1534_v12  ;;  %v192_v18 = vld [vmem:[%s1964_s3 + $0x30] sm:$0xff]  ;;  %s1366_s15 = sshll.u32 %s1960_s19, 4 }
  0x5b   : > { %197 = vst.msk [vmem:[#allocation2 + $0x19] sm:$0xff] %vm194_vm1, %v188_v6  ;;  %199 = vst.msk [vmem:[#allocation2 + $0x31] sm:$0xff] %vm194_vm1, %v190_v10  ;;  %v187_v19 = vld [vmem:[%s1964_s3 + $0x8] sm:$0xff]  ;;  %v193_v20 = vld [vmem:[%s1964_s3 + $0x38] sm:$0xff]  ;;  %s176_s17 = scalar_lea.vmem [#allocation8], %s1366_s15  ;;  %s1397_s5 = sshll.u32 %s1836_s13, 8 }
  0x5c   : > { %198 = vst.msk [vmem:[#allocation2 + $0x21] sm:$0xff] %vm194_vm1, %v189_v14  ;;  %200 = vst.msk [vmem:[#allocation2 + $0x39] sm:$0xff] %vm194_vm1, %v191_v15  ;;  %1559 = vmatprep.subr.bf16.mxu0 %v1558_v16  ;;  %v379_v21 = vld [vmem:[#allocation6 + $0x20] sm:$0xff]  ;;  %v380_v22 = vld [vmem:[#allocation6 + $0x28] sm:$0xff]  ;;  %s1273_s4 = sshll.u32 %s176_s17, 4  ;;  %s2021_s23 = scalar_lea.hbm %s2067_s2, %s1397_s5  ;;  %s2016_s4 = int_to_ptr.vmem [resolvable:$true] %s1273_s4 }
  0x5d   : > { %195 = vst.msk [vmem:[#allocation2 + $0x1] sm:$0xff] %vm194_vm1, %v186_v17  ;;  %201 = vst.msk [vmem:[#allocation2 + $0x49] sm:$0xff] %vm194_vm1, %v192_v18  ;;  %v908_v23 = vld [vmem:[#allocation6 + $0x80] sm:$0xff]  ;;  %v909_v24 = vld [vmem:[#allocation6 + $0x88] sm:$0xff]  ;;  %v1538_v27 = vpack.c.bf16 %v380_v22, %v379_v21  ;;  %s1260_s28 = scalar_lea.sflag [#allocation5], %s1960_s19  ;;  %s1720_s13 = scalar_lea.vmem %s2016_s4, 256 }
  0x5e   : > { %196 = vst.msk [vmem:[#allocation2 + $0x9] sm:$0xff] %vm194_vm1, %v187_v19  ;;  %202 = vst.msk [vmem:[#allocation2 + $0x51] sm:$0xff] %vm194_vm1, %v193_v20  ;;  %v1562_v30 = vpack.c.bf16 %v909_v24, %v908_v23  ;;  %v468_v33 = vld [vmem:[#allocation6 + $0x30] sm:$0xff]  ;;  %v469_v34 = vld [vmem:[#allocation6 + $0x38] sm:$0xff]  ;;  %p1721_p4 = scmp.ne.s32.totalorder %s2016_s4, %s1720_s13  ;;  %s1797_s6 = smov [#allocation8]  }
  0x5f   : > { %v996_v35 = vld [vmem:[#allocation6 + $0x90] sm:$0xff]  ;;  %v997_v36 = vld [vmem:[#allocation6 + $0x98] sm:$0xff]  ;;  %v1542_v39 = vpack.c.bf16 %v469_v34, %v468_v33  ;;  %v556_v43 = vld [vmem:[#allocation6 + $0x40] sm:$0xff]  ;;  %s1724_s7 = sshll.u32 %s1797_s6, 4  ;;  %s1725_s7 = int_to_ptr.vmem [resolvable:$false] %s1724_s7 }
  0x60   : > { %v1566_v41 = vpack.c.bf16 %v997_v36, %v996_v35  ;;  %v557_v44 = vld [vmem:[#allocation6 + $0x48] sm:$0xff]  ;;  %v1084_v45 = vld [vmem:[#allocation6 + $0xa0] sm:$0xff]  ;;  %v644_v53 = vld [vmem:[#allocation6 + $0x50] sm:$0xff]  ;;  %p1722_p6 = pnand %p1721_p4, %p1909_p12  ;;  %s1726_s20 = scalar_lea.vmem %s1725_s7, 512 }
  0x61   : > { %v1085_v46 = vld [vmem:[#allocation6 + $0xa8] sm:$0xff]  ;;  %v1546_v49 = vpack.c.bf16 %v557_v44, %v556_v43  ;;  %v645_v54 = vld [vmem:[#allocation6 + $0x58] sm:$0xff]  ;;  %v1172_v55 = vld [vmem:[#allocation6 + $0xb0] sm:$0xff]  ;;  %p1727_p10 = scmp.lt.s32.totalorder %s2016_s4, %s1725_s7  ;;  %p1728_p13 = scmp.lt.s32.totalorder %s1726_s20, %s1720_s13 }
  0x62   : > { %v208_v25 = vld [vmem:[#allocation2 + $0x18] sm:$0xff]  ;;  %v376_v40 = vld [vmem:[#allocation2 + $0x30] sm:$0xff]  ;;  %v1570_v51 = vpack.c.bf16 %v1085_v46, %v1084_v45  ;;  %v1550_v59 = vpack.c.bf16 %v645_v54, %v644_v53  ;;  %p1723_p8 = pneg %p1722_p6 }
  0x63   : > { %1450 = vmatprep.mubr.msk.f32.mxu1 %vm194_vm1, %v208_v25  ;;  %v729_v26 = vld [vmem:[#allocation2 + $0x31] sm:$0xff]  ;;  %v209_v28 = vld [vmem:[#allocation2 + $0x20] sm:$0xff]  ;;  %p1729_p3 = por %p1728_p13, %p1727_p10 }
  0x64   : > { %1492 = vmatprep.mubr.msk.f32.mxu0 %vm194_vm1, %v729_v26  ;;  %v730_v29 = vld [vmem:[#allocation2 + $0x39] sm:$0xff]  ;;  %1451 = vmatmul.mubr.msk.f32.vlgmr.msra.gmra.mrb[0].mxu1 %vm194_vm1, %v209_v28  ;;  %v817_v32 = vld [vmem:[#allocation2 + $0x49] sm:$0xff]  ;;  %v553_v60 = vld [vmem:[#allocation2 + $0x1] sm:$0xff] }
  0x65   : > { %1493 = vmatmul.mubr.msk.f32.vlgmr.msra.gmra.mrb[0].mxu0 %vm194_vm1, %v730_v29  ;;  %v203_v31 = vld [vmem:[#allocation2] sm:$0xff]  ;;  %1537 = vmatpush3.bf16.msra.mxu1 %v1534_v12  ;;  %v204_v37 = vld [vmem:[#allocation2 + $0x8] sm:$0xff]  ;;  %v818_v38 = vld [vmem:[#allocation2 + $0x51] sm:$0xff]  ;;  %p1730_p7 = pnand %p1729_p3, %p1723_p8 }
  0x66   : > { %1561 = vmatpush3.bf16.msra.mxu0 %v1558_v16  ;;  %1457 = vmatprep.mubr.msk.f32.mxu1 %vm194_vm1, %v203_v31  ;;  %v905_v42 = vld [vmem:[#allocation2 + $0x2] sm:$0xff]  ;;  %v377_v47 = vld [vmem:[#allocation2 + $0x38] sm:$0xff]  ;;  %v906_v48 = vld [vmem:[#allocation2 + $0xa] sm:$0xff] }
  0x67   : > { %1539 = vmatprep.subr.bf16.mxu1 %v1538_v27  ;;  %1499 = vmatprep.mubr.msk.f32.mxu0 %vm194_vm1, %v817_v32  ;;  %v465_v50 = vld [vmem:[#allocation2 + $0x48] sm:$0xff]  ;;  %v993_v52 = vld [vmem:[#allocation2 + $0x1a] sm:$0xff]  ;;  %v466_v57 = vld [vmem:[#allocation2 + $0x50] sm:$0xff] }
  0x68   : > { %1563 = vmatprep.subr.bf16.mxu0 %v1562_v30  ;;  %v1173_v56 = vld [vmem:[#allocation6 + $0xb8] sm:$0xff]  ;;  %v994_v58 = vld [vmem:[#allocation2 + $0x22] sm:$0xff]  ;;  %v1169_v2 = vld [vmem:[#allocation2 + $0x4a] sm:$0xff] }
  0x69   : > { %v1574_v61 = vpack.c.bf16 %v1173_v56, %v1172_v55  ;;  %v1081_v62 = vld [vmem:[#allocation2 + $0x32] sm:$0xff]  ;;  %v554_v63 = vld [vmem:[#allocation2 + $0x9] sm:$0xff]  ;;  %v1082_v0 = vld [vmem:[#allocation2 + $0x3a] sm:$0xff] }
  0x6a   : > { %v641_v1 = vld [vmem:[#allocation2 + $0x19] sm:$0xff]  ;;  %v642_v3 = vld [vmem:[#allocation2 + $0x21] sm:$0xff] }
  0x6b   : > { %v1170_v4 = vld [vmem:[#allocation2 + $0x52] sm:$0xff] }
  0x6c   : > { %1458 = vmatmul.mubr.msk.f32.vlgmr.msra.gmra.mrb[0].mxu1 %vm194_vm1, %v204_v37 }
  0x6d   : > { %1500 = vmatmul.mubr.msk.f32.vlgmr.msra.gmra.mrb[0].mxu0 %vm194_vm1, %v818_v38  ;;  %1541 = vmatpush3.bf16.msra.mxu1 %v1538_v27 }
  0x6e   : > { %1565 = vmatpush3.bf16.msra.mxu0 %v1562_v30  ;;  %1464 = vmatprep.mubr.msk.f32.mxu1 %vm194_vm1, %v376_v40 }
  0x6f   : > { %1543 = vmatprep.subr.bf16.mxu1 %v1542_v39  ;;  %1506 = vmatprep.mubr.msk.f32.mxu0 %vm194_vm1, %v905_v42 }
  0x70   : > { %1567 = vmatprep.subr.bf16.mxu0 %v1566_v41 }
  0x74   : > { %1465 = vmatmul.mubr.msk.f32.vlgmr.msra.gmra.mrb[0].mxu1 %vm194_vm1, %v377_v47 }
  0x75   : > { %1507 = vmatmul.mubr.msk.f32.vlgmr.msra.gmra.mrb[0].mxu0 %vm194_vm1, %v906_v48  ;;  %1545 = vmatpush3.bf16.msra.mxu1 %v1542_v39 }
  0x76   : > { %1569 = vmatpush3.bf16.msra.mxu0 %v1566_v41  ;;  %1471 = vmatprep.mubr.msk.f32.mxu1 %vm194_vm1, %v465_v50 }
  0x77   : > { %1547 = vmatprep.subr.bf16.mxu1 %v1546_v49  ;;  %1513 = vmatprep.mubr.msk.f32.mxu0 %vm194_vm1, %v993_v52 }
  0x78   : > { %1571 = vmatprep.subr.bf16.mxu0 %v1570_v51 }
  0x7c   : > { %1472 = vmatmul.mubr.msk.f32.vlgmr.msra.gmra.mrb[0].mxu1 %vm194_vm1, %v466_v57 }
  0x7d   : > { %1514 = vmatmul.mubr.msk.f32.vlgmr.msra.gmra.mrb[0].mxu0 %vm194_vm1, %v994_v58  ;;  %1549 = vmatpush3.bf16.msra.mxu1 %v1546_v49 }
  0x7e   : > { %1573 = vmatpush3.bf16.msra.mxu0 %v1570_v51  ;;  %1478 = vmatprep.mubr.msk.f32.mxu1 %vm194_vm1, %v553_v60 }
  0x7f   : > { %1551 = vmatprep.subr.bf16.mxu1 %v1550_v59  ;;  %1520 = vmatprep.mubr.msk.f32.mxu0 %vm194_vm1, %v1081_v62 }
  0x80   : > { %1575 = vmatprep.subr.bf16.mxu0 %v1574_v61 }
  0x84   : > { %1479 = vmatmul.mubr.msk.f32.vlgmr.msra.gmra.mrb[0].mxu1 %vm194_vm1, %v554_v63 }
  0x85   : > { %1521 = vmatmul.mubr.msk.f32.vlgmr.msra.gmra.mrb[0].mxu0 %vm194_vm1, %v1082_v0  ;;  %1553 = vmatpush3.bf16.msra.mxu1 %v1550_v59 }
  0x86   : > { %1577 = vmatpush3.bf16.msra.mxu0 %v1574_v61  ;;  %1485 = vmatprep.mubr.msk.f32.mxu1 %vm194_vm1, %v641_v1 }
  0x87   : > { %1527 = vmatprep.mubr.msk.f32.mxu0 %vm194_vm1, %v1169_v2 }
  0x8c   : > { %1486 = vmatmul.mubr.msk.f32.vlgmr.msra.gmra.mrb[0].mxu1 %vm194_vm1, %v642_v3 }
  0x8d   : > { %1528 = vmatmul.mubr.msk.f32.vlgmr.msra.gmra.mrb[0].mxu0 %vm194_vm1, %v1170_v4 }
 0x15f   : > { %v1487_v5 = vpop.f32.mrb[0].mxu1 }
 0x160   : > { %v1529_v6 = vpop.f32.mrb[0].mxu0  ;;  %v718_v8 = vpop.f32.mrb[1].mxu1 }
 0x161   : > { %v1578_v7 = vadd.f32 %v1529_v6, %v1487_v5  ;;  %v1246_v9 = vpop.f32.mrb[1].mxu0 }
 0x162   : > { %v1579_v10 = vadd.f32 %v1246_v9, %v718_v8 }
 0x163   : > { %1258 = vst [vmem:[%s176_s17 + $0x8] sm:$0xff] %v1578_v7 }
 0x164   : > { %1257 = vst [vmem:[%s176_s17] sm:$0xff] %v1579_v10 }
 0x165   : > { %1733 = shalt.err (!%p1730_p7)
}
 0x166   : > { %s1734_s18 = scalar_lea.hbm %s2021_s23, 256  ;;  %s1738_s26 = scalar_lea.hbm %s2067_s2, 512 }
 0x167   : > { %p1735_p9 = scmp.ne.s32.totalorder %s2021_s23, %s1734_s18  ;;  %p1739_p5 = scmp.lt.u32.totalorder %s2021_s23, %s2067_s2 }
 0x168   : > { %p1740_p11 = scmp.lt.u32.totalorder %s1738_s26, %s1734_s18  ;;  %p1742_p4 = scmp.lt.u32.totalorder %s1734_s18, %s2021_s23 }
 0x169   : > { %p1736_p1 = pnand %p1735_p9, %p1909_p12 }
 0x16a   : > { %p1741_p2 = por %p1740_p11, %p1739_p5 }
 0x16b   : > { %p1737_p0 = pneg %p1736_p1 }
 0x16c   : > { %p1743_p6 = por %p1742_p4, %p1741_p2 }
 0x16e   : > { %p1744_p8 = pnand %p1743_p6, %p1737_p0 }
 0x170   : > { %1747 = shalt.err (!%p1744_p8)
}
 0x171   : > { %s1798_s3 = smov 128   ;;  %s1799_s15 = smov 8  }
 0x172   : > { %1606 = dma.vmem_to_hbm [thread:$0]  (%p1909_p12), %s2016_s4, 256, %s2021_s23, %s1260_s28, %s1798_s3, %s1798_s3, %s1799_s15  }
 0x173 PF: > { %s1288_s17 = sand.u32 1, %s1778_s9   ;;  %p2082_p10 = scmp.ne.s32.totalorder %s2072_s16, 0 }
 0x174   : > { %p2083_p13 = scmp.ge.s32.totalorder %s1790_s12, 2  ;;  %s1289_s5 = scalar_lea.sflag [#allocation5], %s1288_s17 }
 0x176   : > { %p1617_p3 = pnand %p2083_p13, %p2082_p10 }
 0x178   : > { %1773 = dma.done.wait (!%p1617_p3), %s1289_s5, 256  }
 0x179   : > { %1775 = vsyncadd (!%p1617_p3), %s1289_s5, 4294967040  ;;  %p16_p7 = scmp.ge.s32.totalorder %s1871_s21, 4   ;;  %s2084_s9 = smov %s1782_s10 }
 0x17a   : > { %s2085_s10 = smov %s1786_s11  ;;  %s2086_s11 = smov %s1905_s8 }
 0x17b   : > { %s2087_s12 = smov %s1871_s21  ;;  %18 = sbr.rel (!%p16_p7) target bundleno = 6 (0x6), region = 91 }
 0x182   :  { %1294 = vsyncpa [#allocation4], 1 }
 0x183   :  { %1296 = vsyncpa [#allocation4 + $0x1], 1 }
 0x184   :  { %1297 = vsyncpa [#allocation7], 1 }
 0x185   :  { %1298 = vsyncpa [#allocation5], 1 }
 0x186   :  { %1300 = vsyncpa [#allocation5 + $0x1], 1 }

</bundles_post_ra>
